<compile_context>
chip_gen: v7x
topology: tpu7x:2x2x1
jax: 0.10.0
libtpu: 0.0.40
codegen_flags: <defaults>
</compile_context>

<pallas_src>
import math

import jax
import jax.numpy as jnp
from jax.experimental import pallas as pl
from jax.experimental.pallas import tpu as pltpu

_HALF_LOG_2PI = 0.5 * math.log(2.0 * math.pi)


def _round_up(n, m):
    return ((n + m - 1) // m) * m


def _choose_tile_b(B):
    # Batch tile: rows on the input side, lanes on the (transposed) output side.
    # Always a multiple of 128 so the (TILE_B,128)->(128,TILE_B) transpose and
    # the (OUT_ROWS, TILE_B) output block sit on native (8,128) tiling.
    # Capped at 1024 rows; large batches target >= ~4 grid steps (v7x megacore).
    if B <= 512:
        return min(1024, _round_up(B, 128))
    return max(128, min(1024, _round_up(pl.cdiv(B, 4), 128)))


def gaussian_policy_kernel(
    x_ref, a_ref, eps_ref,
    w1_ref, w2_ref, w3_ref,       # mu MLP weights (in, out) layout
    misc_ref,                     # rows: [b1 | b2 | b3 | log_std], lane-padded
    out_ref,                      # transposed packed slab (OUT_ROWS, TILE_B)
):
    x = x_ref[...]
    misc = misc_ref[...]
    h1d = w1_ref.shape[1]
    h2d = w2_ref.shape[1]
    A = w3_ref.shape[1]

    b1 = misc[0:1, :h1d]
    b2 = misc[1:2, :h2d]
    b3 = misc[2:3, :A]
    log_std = misc[3:4, :A]

    # --- mu MLP: tanh -> tanh -> linear ---
    h1 = jnp.tanh(jnp.dot(x, w1_ref[...], preferred_element_type=jnp.float32) + b1)
    h2 = jnp.tanh(jnp.dot(h1, w2_ref[...], preferred_element_type=jnp.float32) + b2)
    mu = jnp.dot(h2, w3_ref[...], preferred_element_type=jnp.float32) + b3   # (TB, A)

    std = jnp.exp(log_std)        # (1, A) rows -> EUP, negligible
    inv_std = jnp.exp(-log_std)

    eps = eps_ref[...]            # (TB, A)
    pi = mu + std * eps           # reparameterized sample

    base = -(log_std + jnp.float32(_HALF_LOG_2PI))                     # (1, A)
    # (pi - mu) / std == eps by construction -> logp_pi straight from eps.
    logp_pi = jnp.sum(-0.5 * eps * eps + base, axis=-1, keepdims=True)  # (TB, 1)
    z = (a_ref[...] - mu) * inv_std
    logp = jnp.sum(-0.5 * z * z + base, axis=-1, keepdims=True)         # (TB, 1)

    # Pack [pi | logp | logp_pi | 0-pad] into (TB, 128), transpose once on the
    # XLU (canonical 128-multiple shape), keep the first OUT_ROWS sublanes.
    # The resulting store is full-width / unmasked (last dim = TILE_B, a
    # multiple of 128) and only OUT_ROWS * TILE_B * 4 bytes go back to HBM.
    tb = x.shape[0]
    out_rows = out_ref.shape[0]
    pad = 128 - (A + 2)
    parts = [pi, logp, logp_pi]
    if pad > 0:
        parts.append(jnp.zeros((tb, pad), jnp.float32))
    packed = jnp.concatenate(parts, axis=-1)          # (TB, 128)
    out_ref[...] = jnp.transpose(packed)[0:out_rows, :]


@jax.jit
def _gaussian_policy_pallas(x, a, eps, params):
    w1, b1, w2, b2, w3, b3, log_std = params
    B, in_dim = x.shape
    h1d = w1.shape[1]
    h2d = w2.shape[1]
    A = w3.shape[1]
    assert A + 2 <= 128

    TILE_B = _choose_tile_b(B)
    OUT_B = _round_up(B, 128)          # padding only on the (tiny) output side
    OUT_ROWS = _round_up(A + 2, 8)     # pi rows + logp + logp_pi, padded to 8
    grid = (pl.cdiv(B, TILE_B),)

    # Consolidate skinny parameters into one resident block (fewer operands).
    h_max = max(h1d, h2d, A)
    misc = jnp.zeros((4, h_max), jnp.float32)
    misc = misc.at[0, :h1d].set(b1.reshape(-1))
    misc = misc.at[1, :h2d].set(b2.reshape(-1))
    misc = misc.at[2, :A].set(b3.reshape(-1))
    misc = misc.at[3, :A].set(log_std.reshape(-1))

    row = lambda i: (i, 0)      # activation tiles walk the batch (row) axis
    fixed = lambda i: (0, 0)    # parameters resident in VMEM across the grid
    col = lambda i: (0, i)      # transposed output walks the batch (lane) axis

    packed = pl.pallas_call(
        gaussian_policy_kernel,
        out_shape=jax.ShapeDtypeStruct((OUT_ROWS, OUT_B), jnp.float32),
        grid=grid,
        in_specs=[
            pl.BlockSpec((TILE_B, in_dim), row),   # x     (partial last block OK)
            pl.BlockSpec((TILE_B, A), row),        # a
            pl.BlockSpec((TILE_B, A), row),        # eps
            pl.BlockSpec((in_dim, h1d), fixed),    # w1
            pl.BlockSpec((h1d, h2d), fixed),       # w2
            pl.BlockSpec((h2d, A), fixed),         # w3
            pl.BlockSpec((4, h_max), fixed),       # [b1; b2; b3; log_std]
        ],
        out_specs=pl.BlockSpec((OUT_ROWS, TILE_B), col),
        compiler_params=pltpu.CompilerParams(
            dimension_semantics=("parallel",)),
    )(x, a, eps, w1, w2, w3, misc)

    pi = packed[:A, :B].T          # (B, A)
    logp = packed[A, :B]           # (B,)
    logp_pi = packed[A + 1, :B]    # (B,)
    return pi, logp, logp_pi


def gaussian_policy_forward(x, eps, params, a=None):
    """Matches GaussianPolicy.forward(x, a): returns (pi, logp, logp_pi)."""
    a_in = a if a is not None else jnp.zeros_like(eps)
    pi, logp, logp_pi = _gaussian_policy_pallas(x, a_in, eps, params)
    return pi, (logp if a is not None else None), logp_pi


def init_linear(key, in_dim, out_dim):
    # PyTorch nn.Linear default weight init: U(-1/sqrt(in), 1/sqrt(in)).
    # Bias is zeroed in MLP.__init__ (nn.init.zeros_).
    bound = 1.0 / math.sqrt(in_dim)
    w = jax.random.uniform(key, (in_dim, out_dim), jnp.float32, -bound, bound)
    b = jnp.zeros((1, out_dim), jnp.float32)
    return w, b


if __name__ == "__main__":
    # Small shapes consistent with the module (2 hidden layers of 32).
    batch = 8
    input_dim = 16
    hidden_dims = (32, 32)
    action_dim = 4

    key = jax.random.PRNGKey(0)
    keys = jax.random.split(key, 8)

    # mu MLP: [input_dim, 32, 32, action_dim]
    w1, b1 = init_linear(keys[0], input_dim, hidden_dims[0])
    w2, b2 = init_linear(keys[1], hidden_dims[0], hidden_dims[1])
    w3, b3 = init_linear(keys[2], hidden_dims[1], action_dim)
    # log_std = -0.5 * ones(action_dim)
    log_std = jnp.full((1, action_dim), -0.5, jnp.float32)

    params = (w1, b1, w2, b2, w3, b3, log_std)

    x = jax.random.normal(keys[3], (batch, input_dim), jnp.float32)
    a = jax.random.normal(keys[4], (batch, action_dim), jnp.float32)
    # Standard-normal noise for the reparameterized Normal sample
    # (torch's policy.sample() draws this internally; supplied explicitly here).
    eps = jax.random.normal(keys[5], (batch, action_dim), jnp.float32)

    pi, logp, logp_pi = gaussian_policy_forward(x, eps, params, a=a)
    jax.block_until_ready((pi, logp, logp_pi))

    assert pi.shape == (batch, action_dim)
    assert logp.shape == (batch,)
    assert logp_pi.shape == (batch,)
    assert bool(jnp.all(jnp.isfinite(pi)))
    assert bool(jnp.all(jnp.isfinite(logp)))
    assert bool(jnp.all(jnp.isfinite(logp_pi)))

    # Also exercise the a=None path (logp must be None, as in the PyTorch module).
    pi2, logp2, logp_pi2 = gaussian_policy_forward(x, eps, params, a=None)
    jax.block_until_ready((pi2, logp_pi2))
    assert logp2 is None
    print("KERNEL_OK")
</pallas_src>

<mosaic_0001>
module attributes {stable_mosaic.version = 11 : i64} {
  func.func @gaussian_policy_kernel(%arg0: i32, %arg1: memref<128x16xf32, #tpu.memory_space<vmem>>, %arg2: memref<128x4xf32, #tpu.memory_space<vmem>>, %arg3: memref<128x4xf32, #tpu.memory_space<vmem>>, %arg4: memref<16x32xf32, #tpu.memory_space<vmem>>, %arg5: memref<32x32xf32, #tpu.memory_space<vmem>>, %arg6: memref<32x4xf32, #tpu.memory_space<vmem>>, %arg7: memref<4x32xf32, #tpu.memory_space<vmem>>, %arg8: memref<8x128xf32, #tpu.memory_space<vmem>>) attributes {dimension_semantics = [#tpu.dimension_semantics<parallel>], iteration_bounds = array<i64: 1>, scalar_prefetch = 0 : i64, scratch_operands = 0 : i64, tpu.core_type = #tpu.core_type<tc>, window_params = [{transform_indices = @transform_0, window_bounds = array<i64: 128, 16>}, {transform_indices = @transform_1, window_bounds = array<i64: 128, 4>}, {transform_indices = @transform_2, window_bounds = array<i64: 128, 4>}, {pipeline_mode = #tpu.pipeline_mode<synchronous>, transform_indices = @transform_3, window_bounds = array<i64: 16, 32>}, {pipeline_mode = #tpu.pipeline_mode<synchronous>, transform_indices = @transform_4, window_bounds = array<i64: 32, 32>}, {pipeline_mode = #tpu.pipeline_mode<synchronous>, transform_indices = @transform_5, window_bounds = array<i64: 32, 4>}, {pipeline_mode = #tpu.pipeline_mode<synchronous>, transform_indices = @transform_6, window_bounds = array<i64: 4, 32>}, {transform_indices = @transform_7, window_bounds = array<i64: 8, 128>}]} {
    %c0 = arith.constant 0 : index
    %c0_0 = arith.constant 0 : index
    %0 = vector.load %arg1[%c0, %c0_0] : memref<128x16xf32, #tpu.memory_space<vmem>>, vector<128x16xf32>
    %c0_1 = arith.constant 0 : index
    %c0_2 = arith.constant 0 : index
    %1 = vector.load %arg7[%c0_1, %c0_2] : memref<4x32xf32, #tpu.memory_space<vmem>>, vector<4x32xf32>
    %2 = vector.extract_strided_slice %1 {offsets = [0, 0], sizes = [1, 32], strides = [1, 1]} : vector<4x32xf32> to vector<1x32xf32>
    %3 = vector.extract_strided_slice %1 {offsets = [1, 0], sizes = [1, 32], strides = [1, 1]} : vector<4x32xf32> to vector<1x32xf32>
    %4 = vector.extract_strided_slice %1 {offsets = [2, 0], sizes = [1, 4], strides = [1, 1]} : vector<4x32xf32> to vector<1x4xf32>
    %5 = vector.extract_strided_slice %1 {offsets = [3, 0], sizes = [1, 4], strides = [1, 1]} : vector<4x32xf32> to vector<1x4xf32>
    %c0_3 = arith.constant 0 : index
    %c0_4 = arith.constant 0 : index
    %6 = vector.load %arg4[%c0_3, %c0_4] : memref<16x32xf32, #tpu.memory_space<vmem>>, vector<16x32xf32>
    %cst = arith.constant dense<0.000000e+00> : vector<128x32xf32>
    %7 = tpu.matmul %0, %6, %cst {dimension_numbers = #tpu.dot_dimension_numbers<[1], [0], [0], [1], [0, 0, 1, 1], [], []>} : vector<128x16xf32>, vector<16x32xf32>, vector<128x32xf32> -> vector<128x32xf32>
    %8 = vector.broadcast %2 : vector<1x32xf32> to vector<128x32xf32>
    %9 = arith.addf %7, %8 : vector<128x32xf32>
    %10 = math.tanh %9 : vector<128x32xf32>
    %c0_5 = arith.constant 0 : index
    %c0_6 = arith.constant 0 : index
    %11 = vector.load %arg5[%c0_5, %c0_6] : memref<32x32xf32, #tpu.memory_space<vmem>>, vector<32x32xf32>
    %cst_7 = arith.constant dense<0.000000e+00> : vector<128x32xf32>
    %12 = tpu.matmul %10, %11, %cst_7 {dimension_numbers = #tpu.dot_dimension_numbers<[1], [0], [0], [1], [0, 0, 1, 1], [], []>} : vector<128x32xf32>, vector<32x32xf32>, vector<128x32xf32> -> vector<128x32xf32>
    %13 = vector.broadcast %3 : vector<1x32xf32> to vector<128x32xf32>
    %14 = arith.addf %12, %13 : vector<128x32xf32>
    %15 = math.tanh %14 : vector<128x32xf32>
    %c0_8 = arith.constant 0 : index
    %c0_9 = arith.constant 0 : index
    %16 = vector.load %arg6[%c0_8, %c0_9] : memref<32x4xf32, #tpu.memory_space<vmem>>, vector<32x4xf32>
    %cst_10 = arith.constant dense<0.000000e+00> : vector<128x4xf32>
    %17 = tpu.matmul %15, %16, %cst_10 {dimension_numbers = #tpu.dot_dimension_numbers<[1], [0], [0], [1], [0, 0, 1, 1], [], []>} : vector<128x32xf32>, vector<32x4xf32>, vector<128x4xf32> -> vector<128x4xf32>
    %18 = vector.broadcast %4 : vector<1x4xf32> to vector<128x4xf32>
    %19 = arith.addf %17, %18 : vector<128x4xf32>
    %20 = math.exp %5 : vector<1x4xf32>
    %cst_11 = arith.constant 0.000000e+00 : f32
    %21 = vector.broadcast %cst_11 : f32 to vector<1x4xf32>
    %22 = arith.subf %21, %5 : vector<1x4xf32>
    %23 = math.exp %22 : vector<1x4xf32>
    %c0_12 = arith.constant 0 : index
    %c0_13 = arith.constant 0 : index
    %24 = vector.load %arg3[%c0_12, %c0_13] : memref<128x4xf32, #tpu.memory_space<vmem>>, vector<128x4xf32>
    %25 = vector.broadcast %20 : vector<1x4xf32> to vector<128x4xf32>
    %26 = arith.mulf %25, %24 : vector<128x4xf32>
    %27 = arith.addf %19, %26 : vector<128x4xf32>
    %cst_14 = arith.constant 0.918938517 : f32
    %28 = vector.broadcast %cst_14 : f32 to vector<1x4xf32>
    %29 = arith.addf %5, %28 : vector<1x4xf32>
    %cst_15 = arith.constant 0.000000e+00 : f32
    %30 = vector.broadcast %cst_15 : f32 to vector<1x4xf32>
    %31 = arith.subf %30, %29 : vector<1x4xf32>
    %cst_16 = arith.constant -5.000000e-01 : f32
    %32 = vector.broadcast %cst_16 : f32 to vector<128x4xf32>
    %33 = arith.mulf %32, %24 : vector<128x4xf32>
    %34 = arith.mulf %33, %24 : vector<128x4xf32>
    %35 = vector.broadcast %31 : vector<1x4xf32> to vector<128x4xf32>
    %36 = arith.addf %34, %35 : vector<128x4xf32>
    %cst_17 = arith.constant dense<0.000000e+00> : vector<128xf32>
    %37 = vector.multi_reduction <add>, %36, %cst_17 [1] : vector<128x4xf32> to vector<128xf32>
    %38 = vector.shape_cast %37 : vector<128xf32> to vector<128x1xf32>
    %c0_18 = arith.constant 0 : index
    %c0_19 = arith.constant 0 : index
    %39 = vector.load %arg2[%c0_18, %c0_19] : memref<128x4xf32, #tpu.memory_space<vmem>>, vector<128x4xf32>
    %40 = arith.subf %39, %19 : vector<128x4xf32>
    %41 = vector.broadcast %23 : vector<1x4xf32> to vector<128x4xf32>
    %42 = arith.mulf %40, %41 : vector<128x4xf32>
    %cst_20 = arith.constant -5.000000e-01 : f32
    %43 = vector.broadcast %cst_20 : f32 to vector<128x4xf32>
    %44 = arith.mulf %43, %42 : vector<128x4xf32>
    %45 = arith.mulf %44, %42 : vector<128x4xf32>
    %46 = vector.broadcast %31 : vector<1x4xf32> to vector<128x4xf32>
    %47 = arith.addf %45, %46 : vector<128x4xf32>
    %cst_21 = arith.constant dense<0.000000e+00> : vector<128xf32>
    %48 = vector.multi_reduction <add>, %47, %cst_21 [1] : vector<128x4xf32> to vector<128xf32>
    %49 = vector.shape_cast %48 : vector<128xf32> to vector<128x1xf32>
    %cst_22 = arith.constant 0.000000e+00 : f32
    %50 = vector.broadcast %cst_22 : f32 to vector<128x122xf32>
    %51 = tpu.concatenate %27, %49, %38, %50 in 1 : vector<128x4xf32>, vector<128x1xf32>, vector<128x1xf32>, vector<128x122xf32> -> vector<128x128xf32>
    %52 = tpu.transpose %51, [1, 0] : vector<128x128xf32> -> vector<128x128xf32>
    %53 = vector.extract_strided_slice %52 {offsets = [0, 0], sizes = [8, 128], strides = [1, 1]} : vector<128x128xf32> to vector<8x128xf32>
    %c0_23 = arith.constant 0 : index
    %c0_24 = arith.constant 0 : index
    %54 = vector.load %arg8[%c0_23, %c0_24] : memref<8x128xf32, #tpu.memory_space<vmem>>, vector<8x128xf32>
    tpu.vector_store %arg8[%c0_23, %c0_24], %53 {strides = array<i32>} : memref<8x128xf32, #tpu.memory_space<vmem>>, vector<8x128xf32>,
    return
  }
  func.func @transform_0(%arg0: i32) -> (i32, i32) {
    %c0_i32 = arith.constant 0 : i32
    %c0_i32_0 = arith.constant 0 : i32
    return %arg0, %c0_i32 : i32, i32
  }
  func.func @transform_1(%arg0: i32) -> (i32, i32) {
    %c0_i32 = arith.constant 0 : i32
    %c0_i32_0 = arith.constant 0 : i32
    return %arg0, %c0_i32 : i32, i32
  }
  func.func @transform_2(%arg0: i32) -> (i32, i32) {
    %c0_i32 = arith.constant 0 : i32
    %c0_i32_0 = arith.constant 0 : i32
    return %arg0, %c0_i32 : i32, i32
  }
  func.func @transform_3(%arg0: i32) -> (i32, i32) {
    %c0_i32 = arith.constant 0 : i32
    %c0_i32_0 = arith.constant 0 : i32
    %c0_i32_1 = arith.constant 0 : i32
    return %c0_i32, %c0_i32_0 : i32, i32
  }
  func.func @transform_4(%arg0: i32) -> (i32, i32) {
    %c0_i32 = arith.constant 0 : i32
    %c0_i32_0 = arith.constant 0 : i32
    %c0_i32_1 = arith.constant 0 : i32
    return %c0_i32, %c0_i32_0 : i32, i32
  }
  func.func @transform_5(%arg0: i32) -> (i32, i32) {
    %c0_i32 = arith.constant 0 : i32
    %c0_i32_0 = arith.constant 0 : i32
    %c0_i32_1 = arith.constant 0 : i32
    return %c0_i32, %c0_i32_0 : i32, i32
  }
  func.func @transform_6(%arg0: i32) -> (i32, i32) {
    %c0_i32 = arith.constant 0 : i32
    %c0_i32_0 = arith.constant 0 : i32
    %c0_i32_1 = arith.constant 0 : i32
    return %c0_i32, %c0_i32_0 : i32, i32
  }
  func.func @transform_7(%arg0: i32) -> (i32, i32) {
    %c0_i32 = arith.constant 0 : i32
    %c0_i32_0 = arith.constant 0 : i32
    return %c0_i32, %arg0 : i32, i32
  }
}

</mosaic_0001>

<bundles_post_ra>
// kernel: _gaussian_policy_pallas.1
= control target key start
LH: loop header
LB: loop body
LE: loop exit
PB: predicated region body
PF: predicated region fallthrough
CT: control target
= control target key end

     0   :  { %vm49_vm0 = vcmask 130048   ;;  %v45_v28 = vlaneseq  ;;  %vm267_vm1 = vcmask 261120   ;;  %vm789_vm2 = vcmask 31744   ;;  %s1952_s3 = inlined_call_operand.vmem [shape: f32[16,32], index: 3, kind: input, shape index: {}]   ;;  %s1953_s0 = inlined_call_operand.vmem [shape: f32[8,16], index: 0, kind: input, shape index: {}]   ;;  %s1954_s4 = inlined_call_operand.vmem [shape: f32[32,32], index: 4, kind: input, shape index: {}]   ;;  %s1955_s5 = inlined_call_operand.vmem [shape: f32[32,4], index: 5, kind: input, shape index: {}]   ;;  %s1956_s6 = inlined_call_operand.vmem [shape: f32[4,32], index: 6, kind: input, shape index: {}]   ;;  %s1957_s2 = inlined_call_operand.vmem [shape: f32[8,4], index: 2, kind: input, shape index: {}]   ;;  %s1958_s1 = inlined_call_operand.vmem [shape: f32[8,4], index: 1, kind: input, shape index: {}]   ;;  %s1959_s7 = inlined_call_operand.vmem [shape: f32[8,128], index: 7, kind: output, shape index: {}]  }
   0x1   :  { %v43_v0 = vld [vmem:[%s1952_s3] sm:$0xff]  ;;  %v44_v1 = vld [vmem:[%s1952_s3 + $0x8] sm:$0xff]  ;;  %v28_v7 = vld [vmem:[%s1953_s0 + $0x10] sm:$0xff]  ;;  %vm1002_vm3 = vcmask 39936   ;;  %vm1019_vm4 = vcmask 48128  }
   0x2   :  { %v26_v2 = vld [vmem:[%s1953_s0] sm:$0xff]  ;;  %v1271_v3 = vpack.c.bf16 %v44_v1, %v43_v0  ;;  %v27_v5 = vld [vmem:[%s1953_s0 + $0x8] sm:$0xff]  ;;  %v36_v8 = vld [vmem:[%s1953_s0 + $0x50] sm:$0xff]  ;;  %v1489_v29 = vshrl.u32 %v45_v28, 7 }
   0x3   :  { %1183 = vmatprep.mubr.msk.f32.mxu0 %vm49_vm0, %v26_v2  ;;  %v34_v4 = vld [vmem:[%s1953_s0 + $0x40] sm:$0xff]  ;;  %v35_v6 = vld [vmem:[%s1953_s0 + $0x48] sm:$0xff]  ;;  %v29_v12 = vld [vmem:[%s1953_s0 + $0x18] sm:$0xff] }
   0x4   :  { %1272 = vmatprep.subr.bf16.mxu0 %v1271_v3  ;;  %1291 = vmatprep.subr.bf16.mxu1 %v1271_v3  ;;  %v259_v9 = vld [vmem:[%s1954_s4] sm:$0xff]  ;;  %v260_v10 = vld [vmem:[%s1954_s4 + $0x8] sm:$0xff]  ;;  %v37_v13 = vld [vmem:[%s1953_s0 + $0x58] sm:$0xff]  ;;  %v47_v30 = vsub.s32 0, %v1489_v29 }
   0x5   :  { %1274 = vmatpush3.bf16.msra.mxu0 %v1271_v3  ;;  %1292 = vmatpush3.bf16.msra.mxu1 %v1271_v3  ;;  %v1275_v11 = vpack.c.bf16 %v260_v10, %v259_v9  ;;  %v30_v14 = vld [vmem:[%s1953_s0 + $0x20] sm:$0xff]  ;;  %v31_v16 = vld [vmem:[%s1953_s0 + $0x28] sm:$0xff]  ;;  %v32_v18 = vld [vmem:[%s1953_s0 + $0x30] sm:$0xff] }
   0x6   :  { %1195 = vmatprep.mubr.msk.f32.mxu1 %vm49_vm0, %v34_v4  ;;  %v38_v15 = vld [vmem:[%s1953_s0 + $0x60] sm:$0xff]  ;;  %v39_v17 = vld [vmem:[%s1953_s0 + $0x68] sm:$0xff]  ;;  %v40_v19 = vld [vmem:[%s1953_s0 + $0x70] sm:$0xff] }
   0x7   :  { %1276 = vmatprep.subr.bf16.mxu1 %v1275_v11  ;;  %v33_v20 = vld [vmem:[%s1953_s0 + $0x38] sm:$0xff]  ;;  %v261_v22 = vld [vmem:[%s1954_s4 + $0x10] sm:$0xff]  ;;  %v477_v25 = vld [vmem:[%s1955_s5] sm:$0xff] }
   0x8   :  { %1184 = vmatmul.mubr.msk.f32.vlgmr.msra.gmra.mrb[0].mxu0 %vm49_vm0, %v27_v5  ;;  %1196 = vmatmul.mubr.msk.f32.vlgmr.msra.gmra.mrb[0].mxu1 %vm49_vm0, %v35_v6  ;;  %v41_v21 = vld [vmem:[%s1953_s0 + $0x78] sm:$0xff]  ;;  %v478_v26 = vld [vmem:[%s1955_s5 + $0x8] sm:$0xff]  ;;  %v1495_v31 = vld [vmem:[%s1956_s6] sm:$0xf] }
   0x9   :  { %1186 = vmatprep.mubr.msk.f32.mxu0 %vm49_vm0, %v28_v7  ;;  %1198 = vmatprep.mubr.msk.f32.mxu1 %vm49_vm0, %v36_v8  ;;  %v262_v23 = vld [vmem:[%s1954_s4 + $0x18] sm:$0xff]  ;;  %v1283_v27 = vpack.c.bf16 %v478_v26, %v477_v25  ;;  %v1498_v32 = vrot.slane %v1495_v31, %v47_v30 }
   0xa   :  { %1278 = vmatpush3.bf16.msra.mxu1 %v1275_v11  ;;  %v1279_v24 = vpack.c.bf16 %v262_v23, %v261_v22  ;;  %v1545_v23 = vld [vmem:[%s1957_s2 + $0x8] sm:$0xff]  ;;  %v1555_v25 = vld [vmem:[%s1957_s2 + $0x18] sm:$0xff] }
   0xb   :  { %1284 = vmatprep.subr.bf16.mxu0 %v1283_v27  ;;  %v740_v30 = vmul.f32 -0.5, %v1555_v25 }
   0xc   :  { %1187 = vmatmul.mubr.msk.f32.gmra.mrb[2].mxu0 %vm49_vm0, %v29_v12  ;;  %1199 = vmatmul.mubr.msk.f32.gmra.mrb[2].mxu1 %vm49_vm0, %v37_v13 }
   0xd   :  { %1189 = vmatprep.mubr.msk.f32.mxu0 %vm49_vm0, %v30_v14  ;;  %1201 = vmatprep.mubr.msk.f32.mxu1 %vm49_vm0, %v38_v15 }
   0xe   :  { %1280 = vmatprep.subr.bf16.mxu1 %v1279_v24  ;;  %1286 = vmatpush3.bf16.msra.mxu0 %v1283_v27  ;;  %v738_v27 = vmul.f32 -0.5, %v1545_v23 }
   0xf   :  { %1282 = vmatpush3.bf16.msra.mxu1 %v1279_v24  ;;  %v1550_v24 = vld [vmem:[%s1957_s2 + $0x10] sm:$0xff] }
  0x10   :  { %1190 = vmatmul.mubr.msk.f32.gmra.mrb[4].mxu0 %vm49_vm0, %v31_v16  ;;  %1202 = vmatmul.mubr.msk.f32.gmra.mrb[4].mxu1 %vm49_vm0, %v39_v17  ;;  %v479_v17 = vld [vmem:[%s1955_s5 + $0x10] sm:$0xff]  ;;  %v739_v28 = vmul.f32 -0.5, %v1550_v24 }
  0x11   :  { %1192 = vmatprep.mubr.msk.f32.mxu0 %vm49_vm0, %v32_v18  ;;  %1204 = vmatprep.mubr.msk.f32.mxu1 %vm49_vm0, %v40_v19  ;;  %v480_v18 = vld [vmem:[%s1955_s5 + $0x18] sm:$0xff] }
  0x12   :  { %v1287_v19 = vpack.c.bf16 %v480_v18, %v479_v17 }
  0x14   :  { %1193 = vmatmul.mubr.msk.f32.gmra.mrb[6].mxu0 %vm49_vm0, %v33_v20  ;;  %1205 = vmatmul.mubr.msk.f32.gmra.mrb[6].mxu1 %vm49_vm0, %v41_v21  ;;  %v735_v20 = vadd.f32 0.9189385, %v1495_v31  ;;  %v1540_v21 = vsub.s32 3, %v1489_v29 }
  0x15   :  { %1288 = vmatprep.subr.bf16.mxu0 %v1287_v19 }
  0x16   :  { %1290 = vmatpush3.bf16.msra.mxu0 %v1287_v19  ;;  %v736_v22 = vsub.f32 0.0, %v735_v20 }
  0x18   :  { %v1558_v26 = vrot.slane %v736_v22, %v1540_v21 }
  0xdb   :  { %v1185_v33 = vpop.f32.mrb[0].mxu0  ;;  %v1197_v34 = vpop.f32.mrb[0].mxu1 }
  0xdc   :  { %v170_v35 = vadd.f32 %v1185_v33, %v1498_v32  ;;  %v164_v36 = vpop.f32.mrb[1].mxu0  ;;  %v204_v37 = vpop.f32.mrb[1].mxu1  ;;  %v210_v60 = vadd.f32 %v1197_v34, %v1498_v32  ;;  %v754_v33 = vmul.f32 %v738_v27, %v1545_v23  ;;  %v755_v34 = vmul.f32 %v739_v28, %v1550_v24 }
  0xdd   :  { %v165_v38 = vadd.f32 %v164_v36, %v1498_v32  ;;  %v205_v51 = vadd.f32 %v204_v37, %v1498_v32  ;;  %v756_v37 = vmul.f32 %v740_v30, %v1555_v25 }
  0xde   :  { %v775_v36 = vadd.f32 %v1558_v26, %v755_v34 }
  0xdf   :  { %1293 = vtanh.f32 %v165_v38  ;;  %v1188_v39 = vpop.f32.mrb[2].mxu0  ;;  %v1200_v40 = vpop.f32.mrb[2].mxu1 }
  0xe0   :  { %1295 = vtanh.f32 %v170_v35  ;;  %v180_v41 = vadd.f32 %v1188_v39, %v1498_v32  ;;  %v174_v42 = vpop.f32.mrb[3].mxu0  ;;  %v214_v43 = vpop.f32.mrb[3].mxu1  ;;  %v220_v0 = vadd.f32 %v1200_v40, %v1498_v32  ;;  %v774_v35 = vadd.f32 %v1558_v26, %v754_v33 }
  0xe1   :  { %v175_v44 = vadd.f32 %v174_v42, %v1498_v32  ;;  %v215_v61 = vadd.f32 %v214_v43, %v1498_v32  ;;  %v796_v40 = vsel %vm789_vm2, %v775_v36, 0.0 }
  0xe2   :  { %1297 = vtanh.f32 %v180_v41  ;;  %v793_v39 = vsel %vm789_vm2, %v774_v35, 0.0  ;;  %v776_v41 = vadd.f32 %v1558_v26, %v756_v37 }
  0xe3   :  { %1299 = vtanh.f32 %v175_v44  ;;  %v1191_v45 = vpop.f32.mrb[4].mxu0  ;;  %v1203_v46 = vpop.f32.mrb[4].mxu1  ;;  %794 = vadd.xlane.f32.xlu1 %v793_v39 }
  0xe4   :  { %v190_v47 = vadd.f32 %v1191_v45, %v1498_v32  ;;  %v184_v48 = vpop.f32.mrb[5].mxu0  ;;  %v224_v49 = vpop.f32.mrb[5].mxu1  ;;  %v230_v4 = vadd.f32 %v1203_v46, %v1498_v32  ;;  %v799_v43 = vsel %vm789_vm2, %v776_v41, 0.0  ;;  %v265_v46 = vsub.s32 1, %v1489_v29 }
  0xe5   :  { %v185_v50 = vadd.f32 %v184_v48, %v1498_v32  ;;  %v225_v1 = vadd.f32 %v224_v49, %v1498_v32 }
  0xe6   :  { %1301 = vtanh.f32 %v190_v47  ;;  %v1583_v47 = vrot.slane %v1495_v31, %v265_v46 }
  0xe7   :  { %1303 = vtanh.f32 %v185_v50  ;;  %v1194_v52 = vpop.f32.mrb[6].mxu0  ;;  %v1206_v53 = vpop.f32.mrb[6].mxu1  ;;  %797 = vadd.xlane.f32.xlu1 %v796_v40  ;;  %v688_v40 = vld [vmem:[%s1957_s2 + $0x28] sm:$0xff] }
  0xe8   :  { %v200_v54 = vadd.f32 %v1194_v52, %v1498_v32  ;;  %v194_v55 = vpop.f32.mrb[7].mxu0  ;;  %v234_v56 = vpop.f32.mrb[7].mxu1  ;;  %1305 = vtanh.f32 %v205_v51  ;;  %v240_v9 = vadd.f32 %v1206_v53, %v1498_v32  ;;  %v742_v41 = vmul.f32 -0.5, %v688_v40 }
  0xe9   :  { %v1294_v57 = vpop.eup %1293  ;;  %v195_v58 = vadd.f32 %v194_v55, %v1498_v32  ;;  %v235_v6 = vadd.f32 %v234_v56, %v1498_v32  ;;  %v1566_v32 = vld [vmem:[%s1957_s2 + $0x20] sm:$0xff] }
  0xea   :  { %v1296_v59 = vpop.eup %1295  ;;  %1307 = vtanh.f32 %v200_v54  ;;  %1215 = vmatprep.mubr.msk.f32.mxu1 %vm267_vm1, %v1294_v57  ;;  %v741_v38 = vmul.f32 -0.5, %v1566_v32 }
  0xeb   :  { %1309 = vtanh.f32 %v195_v58  ;;  %1216 = vmatmul.mubr.msk.f32.vlgmr.msra.gmra.mrb[8].mxu1 %vm267_vm1, %v1296_v59  ;;  %800 = vadd.xlane.f32.xlu1 %v799_v43  ;;  %v1623_v43 = vld [vmem:[%s1957_s2 + $0x30] sm:$0xff] }
  0xec   :  { %v1298_v62 = vpop.eup %1297  ;;  %1311 = vtanh.f32 %v210_v60  ;;  %v757_v42 = vmul.f32 %v741_v38, %v1566_v32 }
  0xed   :  { %v1300_v63 = vpop.eup %1299  ;;  %1313 = vtanh.f32 %v215_v61 }
  0xee   :  { %1218 = vmatprep.mubr.msk.f32.mxu1 %vm267_vm1, %v1300_v63  ;;  %1315 = vtanh.f32 %v220_v0  ;;  %v777_v44 = vadd.f32 %v1558_v26, %v757_v42  ;;  %v758_v42 = vmul.f32 %v742_v41, %v688_v40 }
  0xef   :  { %1219 = vmatmul.mubr.msk.f32.gmra.mrb[10].mxu1 %vm267_vm1, %v1298_v62  ;;  %1317 = vtanh.f32 %v225_v1 }
  0xf0   :  { %v1302_v2 = vpop.eup %1301  ;;  %1319 = vtanh.f32 %v230_v4  ;;  %v802_v45 = vsel %vm789_vm2, %v777_v44, 0.0  ;;  %v778_v44 = vadd.f32 %v1558_v26, %v758_v42 }
  0xf1   :  { %v1304_v3 = vpop.eup %1303  ;;  %1321 = vtanh.f32 %v235_v6  ;;  %803 = vadd.xlane.f32.xlu1 %v802_v45  ;;  %v743_v45 = vmul.f32 -0.5, %v1623_v43 }
  0xf2   :  { %1221 = vmatprep.mubr.msk.f32.mxu1 %vm267_vm1, %v1304_v3  ;;  %v1306_v5 = vpop.eup %1305  ;;  %1323 = vtanh.f32 %v240_v9  ;;  %v805_v46 = vsel %vm789_vm2, %v778_v44, 0.0 }
  0xf3   :  { %1222 = vmatmul.mubr.msk.f32.gmra.mrb[12].mxu1 %vm267_vm1, %v1302_v2 }
  0xf4   :  { %v1308_v7 = vpop.eup %1307 }
  0xf5   :  { %v1310_v8 = vpop.eup %1309  ;;  %806 = vadd.xlane.f32.xlu1 %v805_v46  ;;  %v843_v46 = vld [vmem:[%s1958_s1 + $0x28] sm:$0xff] }
  0xf6   :  { %1224 = vmatprep.mubr.msk.f32.mxu1 %vm267_vm1, %v1310_v8  ;;  %v1312_v10 = vpop.eup %1311 }
  0xf7   :  { %1225 = vmatmul.mubr.msk.f32.gmra.mrb[14].mxu1 %vm267_vm1, %v1308_v7  ;;  %v1314_v11 = vpop.eup %1313 }
  0xf8   :  { %1227 = vmatprep.mubr.msk.f32.mxu1 %vm267_vm1, %v1306_v5  ;;  %v1316_v12 = vpop.eup %1315 }
  0xf9   :  { %v1318_v13 = vpop.eup %1317 }
  0xfa   :  { %v1320_v14 = vpop.eup %1319 }
  0xfb   :  { %1228 = vmatmul.mubr.msk.f32.gmra.mrb[16].mxu1 %vm267_vm1, %v1312_v10  ;;  %v1322_v15 = vpop.eup %1321 }
  0xfc   :  { %1230 = vmatprep.mubr.msk.f32.mxu1 %vm267_vm1, %v1314_v11  ;;  %v1324_v16 = vpop.eup %1323 }
  0xff   :  { %1231 = vmatmul.mubr.msk.f32.gmra.mrb[18].mxu1 %vm267_vm1, %v1316_v12 }
 0x100   :  { %1233 = vmatprep.mubr.msk.f32.mxu1 %vm267_vm1, %v1318_v13 }
 0x103   :  { %1234 = vmatmul.mubr.msk.f32.gmra.mrb[20].mxu1 %vm267_vm1, %v1320_v14 }
 0x104   :  { %1236 = vmatprep.mubr.msk.f32.mxu1 %vm267_vm1, %v1322_v15 }
 0x107   :  { %1237 = vmatmul.mubr.msk.f32.gmra.mrb[22].mxu1 %vm267_vm1, %v1324_v16 }
 0x1be   :  { %v1217_v48 = vpop.f32.mrb[8].mxu1 }
 0x1bf   :  { %v388_v49 = vadd.f32 %v1217_v48, %v1583_v47  ;;  %v382_v50 = vpop.f32.mrb[9].mxu1  ;;  %v690_v48 = vld [vmem:[%s1957_s2 + $0x38] sm:$0xff] }
 0x1c0   :  { %v383_v51 = vadd.f32 %v382_v50, %v1583_v47 }
 0x1c2   :  { %1325 = vtanh.f32 %v383_v51  ;;  %v1220_v52 = vpop.f32.mrb[10].mxu1  ;;  %v744_v51 = vmul.f32 -0.5, %v690_v48 }
 0x1c3   :  { %1327 = vtanh.f32 %v388_v49  ;;  %v398_v53 = vadd.f32 %v1220_v52, %v1583_v47  ;;  %v392_v54 = vpop.f32.mrb[11].mxu1  ;;  %v683_v49 = vld [vmem:[%s1957_s2] sm:$0xff] }
 0x1c4   :  { %v393_v55 = vadd.f32 %v392_v54, %v1583_v47  ;;  %v737_v52 = vmul.f32 -0.5, %v683_v49  ;;  %v760_v54 = vmul.f32 %v744_v51, %v690_v48 }
 0x1c6   :  { %1329 = vtanh.f32 %v393_v55  ;;  %v1223_v56 = vpop.f32.mrb[12].mxu1  ;;  %v753_v55 = vmul.f32 %v737_v52, %v683_v49 }
 0x1c7   :  { %1331 = vtanh.f32 %v398_v53  ;;  %v408_v57 = vadd.f32 %v1223_v56, %v1583_v47  ;;  %v402_v58 = vpop.f32.mrb[13].mxu1  ;;  %v780_v56 = vadd.f32 %v1558_v26, %v760_v54 }
 0x1c8   :  { %v403_v59 = vadd.f32 %v402_v58, %v1583_v47 }
 0x1c9   :  { %1333 = vtanh.f32 %v408_v57  ;;  %v773_v57 = vadd.f32 %v1558_v26, %v753_v55  ;;  %v811_v58 = vsel %vm789_vm2, %v780_v56, 0.0 }
 0x1ca   :  { %1335 = vtanh.f32 %v403_v59  ;;  %v1226_v60 = vpop.f32.mrb[14].mxu1 }
 0x1cb   :  { %v418_v61 = vadd.f32 %v1226_v60, %v1583_v47  ;;  %v412_v62 = vpop.f32.mrb[15].mxu1  ;;  %v790_v59 = vsel %vm789_vm2, %v773_v57, 0.0  ;;  %v678_v60 = vmul.f32 1.442695, %v1495_v31 }
 0x1cc   :  { %v1326_v63 = vpop.eup %1325  ;;  %v413_v0 = vadd.f32 %v412_v62, %v1583_v47  ;;  %791 = vadd.xlane.f32.xlu0 %v790_v59 }
 0x1cd   :  { %v1328_v1 = vpop.eup %1327  ;;  %1337 = vtanh.f32 %v418_v61  ;;  %1247 = vmatprep.mubr.msk.f32.mxu0 %vm267_vm1, %v1326_v63  ;;  %v680_v61 = vsub.f32 0.0, %v1495_v31 }
 0x1ce   :  { %1339 = vtanh.f32 %v413_v0  ;;  %1248 = vmatmul.mubr.msk.f32.vlgmr.msra.gmra.mrb[8].mxu0 %vm267_vm1, %v1328_v1  ;;  %v1229_v2 = vpop.f32.mrb[16].mxu1  ;;  %v483_v0 = vsub.s32 2, %v1489_v29  ;;  %v1647_v1 = vld [vmem:[%s1957_s2 + $0x40] sm:$0xff] }
 0x1cf   :  { %v428_v3 = vadd.f32 %v1229_v2, %v1583_v47  ;;  %v422_v4 = vpop.f32.mrb[17].mxu1  ;;  %v681_v62 = vmul.f32 1.442695, %v680_v61 }
 0x1d0   :  { %v1330_v5 = vpop.eup %1329  ;;  %v423_v6 = vadd.f32 %v422_v4, %v1583_v47  ;;  %v1654_v4 = vrot.slane %v1495_v31, %v483_v0 }
 0x1d1   :  { %v1332_v7 = vpop.eup %1331  ;;  %1250 = vmatprep.mubr.msk.f32.mxu0 %vm267_vm1, %v1330_v5  ;;  %1341 = vtanh.f32 %v428_v3  ;;  %v745_v3 = vmul.f32 -0.5, %v1647_v1 }
 0x1d2   :  { %1251 = vmatmul.mubr.msk.f32.gmra.mrb[10].mxu0 %vm267_vm1, %v1332_v7  ;;  %1343 = vtanh.f32 %v423_v6  ;;  %v1232_v8 = vpop.f32.mrb[18].mxu1  ;;  %v839_v7 = vld [vmem:[%s1958_s1 + $0x8] sm:$0xff] }
 0x1d3   :  { %v1334_v9 = vpop.eup %1333  ;;  %v438_v10 = vadd.f32 %v1232_v8, %v1583_v47  ;;  %v432_v11 = vpop.f32.mrb[19].mxu1  ;;  %v692_v8 = vld [vmem:[%s1957_s2 + $0x48] sm:$0xff] }
 0x1d4   :  { %v1336_v12 = vpop.eup %1335  ;;  %v433_v13 = vadd.f32 %v432_v11, %v1583_v47 }
 0x1d5   :  { %1253 = vmatprep.mubr.msk.f32.mxu0 %vm267_vm1, %v1336_v12  ;;  %1345 = vtanh.f32 %v438_v10  ;;  %v838_v12 = vld [vmem:[%s1958_s1] sm:$0xff] }
 0x1d6   :  { %1254 = vmatmul.mubr.msk.f32.gmra.mrb[12].mxu0 %vm267_vm1, %v1334_v9  ;;  %1347 = vtanh.f32 %v433_v13  ;;  %v1235_v14 = vpop.f32.mrb[20].mxu1  ;;  %v761_v9 = vmul.f32 %v745_v3, %v1647_v1  ;;  %v746_v13 = vmul.f32 -0.5, %v692_v8  ;;  %v845_v3 = vld [vmem:[%s1958_s1 + $0x38] sm:$0xff] }
 0x1d7   :  { %v1338_v15 = vpop.eup %1337  ;;  %v448_v16 = vadd.f32 %v1235_v14, %v1583_v47  ;;  %v442_v17 = vpop.f32.mrb[21].mxu1 }
 0x1d8   :  { %v1340_v18 = vpop.eup %1339  ;;  %v443_v19 = vadd.f32 %v442_v17, %v1583_v47 }
 0x1d9   :  { %1256 = vmatprep.mubr.msk.f32.mxu0 %vm267_vm1, %v1340_v18  ;;  %1349 = vtanh.f32 %v448_v16 }
 0x1da   :  { %1257 = vmatmul.mubr.msk.f32.gmra.mrb[14].mxu0 %vm267_vm1, %v1338_v15  ;;  %1351 = vtanh.f32 %v443_v19  ;;  %v1238_v20 = vpop.f32.mrb[22].mxu1  ;;  %v841_v19 = vld [vmem:[%s1958_s1 + $0x18] sm:$0xff] }
 0x1db   :  { %v1342_v22 = vpop.eup %1341  ;;  %v458_v27 = vadd.f32 %v1238_v20, %v1583_v47  ;;  %v452_v28 = vpop.f32.mrb[23].mxu1 }
 0x1dc   :  { %v1344_v30 = vpop.eup %1343  ;;  %v453_v33 = vadd.f32 %v452_v28, %v1583_v47  ;;  %v759_v47 = vmul.f32 %v743_v45, %v1623_v43  ;;  %v840_v28 = vld [vmem:[%s1958_s1 + $0x10] sm:$0xff] }
 0x1dd   :  { %1259 = vmatprep.mubr.msk.f32.mxu0 %vm267_vm1, %v1344_v30  ;;  %1353 = vtanh.f32 %v458_v27  ;;  %v1691_v30 = vld [vmem:[%s1957_s2 + $0x50] sm:$0xff] }
 0x1de   :  { %1260 = vmatmul.mubr.msk.f32.gmra.mrb[16].mxu0 %vm267_vm1, %v1342_v22  ;;  %1355 = vtanh.f32 %v453_v33  ;;  %v779_v50 = vadd.f32 %v1558_v26, %v759_v47  ;;  %v762_v33 = vmul.f32 %v746_v13, %v692_v8 }
 0x1df   :  { %v1346_v34 = vpop.eup %1345  ;;  %1357 = vpow2.f32 %v678_v60 }
 0x1e0   :  { %v1348_v35 = vpop.eup %1347  ;;  %v808_v53 = vsel %vm789_vm2, %v779_v50, 0.0  ;;  %1359 = vpow2.f32 %v681_v62  ;;  %v694_v62 = vld [vmem:[%s1957_s2 + $0x58] sm:$0xff] }
 0x1e1   :  { %1262 = vmatprep.mubr.msk.f32.mxu0 %vm267_vm1, %v1348_v35  ;;  %809 = vadd.xlane.f32.xlu1 %v808_v53  ;;  %v782_v53 = vadd.f32 %v1558_v26, %v762_v33 }
 0x1e2   :  { %1263 = vmatmul.mubr.msk.f32.gmra.mrb[18].mxu0 %vm267_vm1, %v1346_v34 }
 0x1e3   :  { %v1350_v36 = vpop.eup %1349 }
 0x1e4   :  { %v1352_v37 = vpop.eup %1351 }
 0x1e5   :  { %1265 = vmatprep.mubr.msk.f32.mxu0 %vm267_vm1, %v1352_v37  ;;  %812 = vadd.xlane.f32.xlu1 %v811_v58  ;;  %v747_v37 = vmul.f32 -0.5, %v1691_v30 }
 0x1e6   :  { %1266 = vmatmul.mubr.msk.f32.gmra.mrb[20].mxu0 %vm267_vm1, %v1350_v36 }
 0x1e7   :  { %v1354_v38 = vpop.eup %1353  ;;  %v763_v57 = vmul.f32 %v747_v37, %v1691_v30 }
 0x1e8   :  { %v1356_v39 = vpop.eup %1355 }
 0x1e9   :  { %1268 = vmatprep.mubr.msk.f32.mxu0 %vm267_vm1, %v1356_v39  ;;  %v1358_v63 = vpop.eup %1357 }
 0x1ea   :  { %1269 = vmatmul.mubr.msk.f32.gmra.mrb[22].mxu0 %vm267_vm1, %v1354_v38  ;;  %v1650_v2 = vrot.slane %v1358_v63, %v1540_v21  ;;  %v1360_v5 = vpop.eup %1359 }
 0x1eb   :  { %v1668_v31 = vrot.slane %v1360_v5, %v1540_v21  ;;  %v781_v21 = vadd.f32 %v1558_v26, %v761_v9 }
 0x1ec   :  { %v703_v29 = vmul.f32 %v1650_v2, %v683_v49  ;;  %v708_v36 = vmul.f32 %v1650_v2, %v688_v40  ;;  %v710_v41 = vmul.f32 %v1650_v2, %v690_v48  ;;  %v709_v42 = vmul.f32 %v1650_v2, %v1623_v43  ;;  %v842_v43 = vld [vmem:[%s1958_s1 + $0x20] sm:$0xff] }
 0x1ed   :  { %v712_v40 = vmul.f32 %v1650_v2, %v692_v8  ;;  %v814_v49 = vsel %vm789_vm2, %v781_v21, 0.0  ;;  %v711_v37 = vmul.f32 %v1650_v2, %v1647_v1  ;;  %v714_v1 = vmul.f32 %v1650_v2, %v694_v62 }
 0x2a1   :  { %v1249_v6 = vpop.f32.mrb[8].mxu0 }
 0x2a2   :  { %v1665_v10 = vadd.f32 %v1249_v6, %v1654_v4  ;;  %v599_v11 = vpop.f32.mrb[9].mxu0 }
 0x2a3   :  { %v600_v14 = vadd.f32 %v599_v11, %v1654_v4 }
 0x2a4   :  { %v855_v15 = vsub.f32 %v839_v7, %v1665_v10  ;;  %v748_v7 = vmul.f32 -0.5, %v694_v62 }
 0x2a5   :  { %v1675_v16 = vadd.f32 %v703_v29, %v600_v14  ;;  %v854_v17 = vsub.f32 %v838_v12, %v600_v14  ;;  %v1252_v18 = vpop.f32.mrb[10].mxu0  ;;  %v844_v12 = vld [vmem:[%s1958_s1 + $0x30] sm:$0xff] }
 0x2a6   :  { %v875_v20 = vmul.f32 %v1668_v31, %v855_v15  ;;  %v1683_v22 = vadd.f32 %v1252_v18, %v1654_v4  ;;  %v609_v27 = vpop.f32.mrb[11].mxu0 }
 0x2a7   :  { %v874_v34 = vmul.f32 %v1668_v31, %v854_v17  ;;  %v1695_v35 = vadd.f32 %v609_v27, %v1654_v4 }
 0x2a8   :  { %v857_v38 = vsub.f32 %v841_v19, %v1683_v22  ;;  %v891_v39 = vmul.f32 -0.5, %v875_v20 }
 0x2a9   :  { %v856_v44 = vsub.f32 %v840_v28, %v1695_v35  ;;  %v1255_v45 = vpop.f32.mrb[12].mxu0  ;;  %v890_v47 = vmul.f32 -0.5, %v874_v34  ;;  %v695_v28 = vld [vmem:[%s1957_s2 + $0x60] sm:$0xff] }
 0x2aa   :  { %v877_v50 = vmul.f32 %v1668_v31, %v857_v38  ;;  %v625_v51 = vadd.f32 %v1255_v45, %v1654_v4  ;;  %v619_v48 = vpop.f32.mrb[13].mxu0  ;;  %v907_v52 = vmul.f32 %v891_v39, %v875_v20  ;;  %v749_v38 = vmul.f32 -0.5, %v695_v28 }
 0x2ab   :  { %v876_v54 = vmul.f32 %v1668_v31, %v856_v44  ;;  %v1717_v55 = vadd.f32 %v619_v48, %v1654_v4  ;;  %v906_v56 = vmul.f32 %v890_v47, %v874_v34  ;;  %v696_v47 = vld [vmem:[%s1957_s2 + $0x68] sm:$0xff] }
 0x2ac   :  { %v1720_v58 = vadd.f32 %v708_v36, %v625_v51  ;;  %v859_v59 = vsub.f32 %v843_v46, %v625_v51  ;;  %v923_v60 = vadd.f32 %v907_v52, %v1558_v26  ;;  %v893_v61 = vmul.f32 -0.5, %v877_v50 }
 0x2ad   :  { %v858_v63 = vsub.f32 %v842_v43, %v1717_v55  ;;  %v1258_v0 = vpop.f32.mrb[14].mxu0  ;;  %v922_v5 = vadd.f32 %v906_v56, %v1558_v26  ;;  %v892_v6 = vmul.f32 -0.5, %v876_v54  ;;  %v847_v43 = vld [vmem:[%s1958_s1 + $0x48] sm:$0xff]  ;;  %v817_v52 = vsel %vm789_vm2, %v782_v53, 0.0 }
 0x2ae   :  { %v879_v29 = vmul.f32 %v1668_v31, %v859_v59  ;;  %v941_v8 = vsel %vm789_vm2, %v923_v60, 0.0  ;;  %v635_v9 = vadd.f32 %v1258_v0, %v1654_v4  ;;  %v629_v11 = vpop.f32.mrb[15].mxu0  ;;  %v909_v13 = vmul.f32 %v893_v61, %v877_v50 }
 0x2af   :  { %v878_v14 = vmul.f32 %v1668_v31, %v858_v63  ;;  %942 = vadd.xlane.f32.xlu1 %v941_v8  ;;  %v630_v15 = vadd.f32 %v629_v11, %v1654_v4  ;;  %v938_v17 = vsel %vm789_vm2, %v922_v5, 0.0  ;;  %v908_v18 = vmul.f32 %v892_v6, %v876_v54 }
 0x2b0   :  { %v1740_v19 = vadd.f32 %v710_v41, %v635_v9  ;;  %v861_v21 = vsub.f32 %v845_v3, %v635_v9  ;;  %939 = vadd.xlane.f32.xlu0 %v938_v17  ;;  %v925_v20 = vadd.f32 %v909_v13, %v1558_v26  ;;  %v895_v27 = vmul.f32 -0.5, %v879_v29 }
 0x2b1   :  { %v1746_v33 = vadd.f32 %v709_v42, %v630_v15  ;;  %v860_v34 = vsub.f32 %v844_v12, %v630_v15  ;;  %v1261_v36 = vpop.f32.mrb[16].mxu0  ;;  %v924_v45 = vadd.f32 %v908_v18, %v1558_v26  ;;  %v894_v46 = vmul.f32 -0.5, %v878_v14 }
 0x2b2   :  { %v947_v39 = vsel %vm789_vm2, %v925_v20, 0.0  ;;  %v645_v41 = vadd.f32 %v1261_v36, %v1654_v4  ;;  %v639_v44 = vpop.f32.mrb[17].mxu0  ;;  %v881_v42 = vmul.f32 %v1668_v31, %v861_v21  ;;  %v911_v51 = vmul.f32 %v895_v27, %v879_v29 }
 0x2b3   :  { %v640_v50 = vadd.f32 %v639_v44, %v1654_v4  ;;  %815 = vadd.xlane.f32.xlu1 %v814_v49  ;;  %v783_v54 = vadd.f32 %v1558_v26, %v763_v57  ;;  %v764_v56 = vmul.f32 %v748_v7, %v694_v62  ;;  %v713_v61 = vmul.f32 %v1650_v2, %v1691_v30  ;;  %v1777_v57 = vld [vmem:[%s1957_s2 + $0x78] sm:$0xff]  ;;  %v846_v30 = vld [vmem:[%s1958_s1 + $0x40] sm:$0xff] }
 0x2b4   :  { %948 = vadd.xlane.f32.xlu0 %v947_v39  ;;  %v1759_v48 = vadd.f32 %v712_v40, %v645_v41  ;;  %v716_v49 = vmul.f32 %v1650_v2, %v696_v47  ;;  %v765_v63 = vmul.f32 %v749_v38, %v695_v28  ;;  %v880_v40 = vmul.f32 %v1668_v31, %v860_v34  ;;  %v849_v44 = vld [vmem:[%s1958_s1 + $0x58] sm:$0xff] }
 0x2b5   :  { %v1766_v59 = vadd.f32 %v711_v37, %v640_v50  ;;  %v1264_v60 = vpop.f32.mrb[18].mxu0  ;;  %v944_v0 = vsel %vm789_vm2, %v924_v45, 0.0  ;;  %v910_v53 = vmul.f32 %v894_v46, %v878_v14  ;;  %v863_v62 = vsub.f32 %v847_v43, %v645_v41  ;;  %v697_v37 = vld [vmem:[%s1957_s2 + $0x70] sm:$0xff] }
 0x2b6   :  { %v655_v3 = vadd.f32 %v1264_v60, %v1654_v4  ;;  %v649_v5 = vpop.f32.mrb[19].mxu0  ;;  %v927_v6 = vadd.f32 %v911_v51, %v1558_v26  ;;  %v897_v29 = vmul.f32 -0.5, %v881_v42  ;;  %v820_v9 = vsel %vm789_vm2, %v783_v54, 0.0 }
 0x2b7   :  { %v1784_v7 = vadd.f32 %v649_v5, %v1654_v4  ;;  %818 = vadd.xlane.f32.xlu1 %v817_v52  ;;  %v784_v11 = vadd.f32 %v1558_v26, %v764_v56  ;;  %v750_v12 = vmul.f32 -0.5, %v696_v47  ;;  %v715_v15 = vmul.f32 %v1650_v2, %v695_v28 }
 0x2b8   :  { %945 = vadd.xlane.f32.xlu0 %v944_v0  ;;  %v1786_v8 = vadd.f32 %v714_v1, %v655_v3  ;;  %v718_v17 = vmul.f32 %v1650_v2, %v1777_v57  ;;  %v785_v18 = vadd.f32 %v1558_v26, %v765_v63  ;;  %v862_v21 = vsub.f32 %v846_v30, %v640_v50 }
 0x2b9   :  { %v1791_v13 = vadd.f32 %v713_v61, %v1784_v7  ;;  %v1267_v14 = vpop.f32.mrb[20].mxu0  ;;  %v926_v20 = vadd.f32 %v910_v53, %v1558_v26  ;;  %v896_v36 = vmul.f32 -0.5, %v880_v40  ;;  %v883_v38 = vmul.f32 %v1668_v31, %v863_v62 }
 0x2ba   :  { %v665_v27 = vadd.f32 %v1267_v14, %v1654_v4  ;;  %v659_v34 = vpop.f32.mrb[21].mxu0  ;;  %v953_v28 = vsel %vm789_vm2, %v927_v6, 0.0  ;;  %v913_v39 = vmul.f32 %v897_v29, %v881_v42  ;;  %v823_v46 = vsel %vm789_vm2, %v784_v11, 0.0 }
 0x2bb   :  { %v1805_v41 = vadd.f32 %v659_v34, %v1654_v4  ;;  %821 = vadd.xlane.f32.xlu1 %v820_v9  ;;  %v766_v50 = vmul.f32 %v750_v12, %v696_v47  ;;  %v751_v51 = vmul.f32 -0.5, %v697_v37  ;;  %v717_v42 = vmul.f32 %v1650_v2, %v697_v37  ;;  %v848_v47 = vld [vmem:[%s1958_s1 + $0x50] sm:$0xff] }
 0x2bc   :  { %954 = vadd.xlane.f32.xlu0 %v953_v28  ;;  %v1810_v45 = vadd.f32 %v716_v49, %v665_v27  ;;  %v826_v52 = vsel %vm789_vm2, %v785_v18, 0.0  ;;  %v882_v54 = vmul.f32 %v1668_v31, %v862_v21  ;;  %v950_v56 = vsel %vm789_vm2, %v926_v20, 0.0 }
 0x2bd   :  { %v1814_v1 = vadd.f32 %v715_v15, %v1805_v41  ;;  %v1270_v43 = vpop.f32.mrb[22].mxu0  ;;  %v912_v60 = vmul.f32 %v896_v36, %v880_v40  ;;  %v865_v63 = vsub.f32 %v849_v44, %v655_v3  ;;  %v929_v0 = vadd.f32 %v913_v39, %v1558_v26  ;;  %v851_v15 = vld [vmem:[%s1958_s1 + $0x68] sm:$0xff]  ;;  %v850_v36 = vld [vmem:[%s1958_s1 + $0x60] sm:$0xff] }
 0x2be   :  { %v675_v61 = vadd.f32 %v1270_v43, %v1654_v4  ;;  %v669_v49 = vpop.f32.mrb[23].mxu0  ;;  %v899_v5 = vmul.f32 -0.5, %v883_v38  ;;  %v786_v30 = vadd.f32 %v1558_v26, %v766_v50  ;;  %v767_v40 = vmul.f32 %v751_v51, %v697_v37 }
 0x2bf   :  { %v670_v53 = vadd.f32 %v669_v49, %v1654_v4  ;;  %824 = vadd.xlane.f32.xlu1 %v823_v46  ;;  %v752_v6 = vmul.f32 -0.5, %v1777_v57  ;;  %v864_v3 = vsub.f32 %v848_v47, %v1784_v7  ;;  %v928_v9 = vadd.f32 %v912_v60, %v1558_v26  ;;  %v852_v60 = vld [vmem:[%s1958_s1 + $0x70] sm:$0xff] }
 0x2c0   :  { %951 = vadd.xlane.f32.xlu0 %v950_v56  ;;  %v1826_v62 = vadd.f32 %v718_v17, %v675_v61  ;;  %v885_v11 = vmul.f32 %v1668_v31, %v865_v63  ;;  %v959_v12 = vsel %vm789_vm2, %v929_v0, 0.0  ;;  %v915_v4 = vmul.f32 %v899_v5, %v883_v38 }
 0x2c1   :  { %v1830_v29 = vadd.f32 %v717_v42, %v670_v53  ;;  %v898_v14 = vmul.f32 -0.5, %v882_v54  ;;  %v829_v17 = vsel %vm789_vm2, %v786_v30, 0.0  ;;  %v787_v18 = vadd.f32 %v1558_v26, %v767_v40  ;;  %v853_v42 = vld [vmem:[%s1958_s1 + $0x78] sm:$0xff] }
 0x2c2   :  { %v768_v7 = vmul.f32 %v752_v6, %v1777_v57  ;;  %v884_v21 = vmul.f32 %v1668_v31, %v864_v3  ;;  %v956_v20 = vsel %vm789_vm2, %v928_v9, 0.0  ;;  %v867_v34 = vsub.f32 %v851_v15, %v665_v27 }
 0x2c3   :  { %827 = vadd.xlane.f32.xlu1 %v826_v52  ;;  %v931_v37 = vadd.f32 %v915_v4, %v1558_v26  ;;  %v914_v38 = vmul.f32 %v898_v14, %v882_v54  ;;  %v901_v28 = vmul.f32 -0.5, %v885_v11  ;;  %v832_v39 = vsel %vm789_vm2, %v787_v18, 0.0 }
 0x2c4   :  { %960 = vadd.xlane.f32.xlu0 %v959_v12  ;;  %v788_v44 = vadd.f32 %v1558_v26, %v768_v7  ;;  %v866_v57 = vsub.f32 %v850_v36, %v1805_v41  ;;  %v900_v46 = vmul.f32 -0.5, %v884_v21  ;;  %v887_v50 = vmul.f32 %v1668_v31, %v867_v34  ;;  %v795_v36 = vpop.xlane.xlu1 %794 }
 0x2c5   :  { %v965_v27 = vsel %vm789_vm2, %v931_v37, 0.0  ;;  %v930_v51 = vadd.f32 %v914_v38, %v1558_v26  ;;  %v917_v43 = vmul.f32 %v901_v28, %v885_v11  ;;  %v869_v41 = vsub.f32 %v853_v42, %v675_v61 }
 0x2c6   :  { %v835_v52 = vsel %vm789_vm2, %v788_v44, 0.0  ;;  %v886_v54 = vmul.f32 %v1668_v31, %v866_v57  ;;  %v916_v56 = vmul.f32 %v900_v46, %v884_v21  ;;  %v903_v47 = vmul.f32 -0.5, %v887_v50  ;;  %v792_v46 = vpop.xlane.xlu0 %791 }
 0x2c7   :  { %830 = vadd.xlane.f32.xlu1 %v829_v17  ;;  %v962_v49 = vsel %vm789_vm2, %v930_v51, 0.0  ;;  %v933_v63 = vadd.f32 %v917_v43, %v1558_v26  ;;  %v868_v0 = vsub.f32 %v852_v60, %v670_v53  ;;  %v889_v30 = vmul.f32 %v1668_v31, %v869_v41 }
 0x2c8   :  { %957 = vadd.xlane.f32.xlu0 %v956_v20  ;;  %v932_v5 = vadd.f32 %v916_v56, %v1558_v26  ;;  %v919_v6 = vmul.f32 %v903_v47, %v887_v50  ;;  %v902_v61 = vmul.f32 -0.5, %v886_v54  ;;  %v798_v37 = vpop.xlane.xlu1 %797  ;;  %v704_v50 = vmul.f32 %v1650_v2, %v1545_v23 }
 0x2c9   :  { %v971_v40 = vsel %vm789_vm2, %v933_v63, 0.0  ;;  %v888_v3 = vmul.f32 %v1668_v31, %v868_v0  ;;  %v905_v4 = vmul.f32 -0.5, %v889_v30  ;;  %v705_v56 = vmul.f32 %v1650_v2, %v1550_v24 }
 0x2ca   :  { %v968_v9 = vsel %vm789_vm2, %v932_v5, 0.0  ;;  %v935_v11 = vadd.f32 %v919_v6, %v1558_v26  ;;  %v918_v12 = vmul.f32 %v902_v61, %v886_v54  ;;  %v706_v54 = vmul.f32 %v1650_v2, %v1555_v25 }
 0x2cb   :  { %833 = vadd.xlane.f32.xlu1 %v832_v39  ;;  %v921_v15 = vmul.f32 %v905_v4, %v889_v30  ;;  %v904_v17 = vmul.f32 -0.5, %v888_v3  ;;  %v707_v0 = vmul.f32 %v1650_v2, %v1566_v32 }
 0x2cc   :  { %966 = vadd.xlane.f32.xlu0 %v965_v27  ;;  %v977_v53 = vsel %vm789_vm2, %v935_v11, 0.0  ;;  %v934_v14 = vadd.f32 %v918_v12, %v1558_v26  ;;  %v801_v38 = vpop.xlane.xlu1 %800  ;;  %v720_v27 = vadd.f32 %v704_v50, %v1665_v10  ;;  %v722_v60 = vadd.f32 %v706_v54, %v1683_v22 }
 0x2cd   :  { %v937_v7 = vadd.f32 %v921_v15, %v1558_v26  ;;  %v920_v21 = vmul.f32 %v904_v17, %v888_v3 }
 0x2ce   :  { %v974_v18 = vsel %vm789_vm2, %v934_v14, 0.0 }
 0x2cf   :  { %836 = vadd.xlane.f32.xlu1 %v835_v52  ;;  %v983_v31 = vsel %vm789_vm2, %v937_v7, 0.0  ;;  %v936_v20 = vadd.f32 %v920_v21, %v1558_v26 }
 0x2d0   :  { %963 = vadd.xlane.f32.xlu0 %v962_v49  ;;  %v804_v28 = vpop.xlane.xlu1 %803  ;;  %v721_v49 = vadd.f32 %v705_v56, %v1695_v35  ;;  %v723_v35 = vadd.f32 %v707_v0, %v1717_v55 }
 0x2d1   :  { %v980_v34 = vsel %vm789_vm2, %v936_v20, 0.0 }
 0x2d4   :  { %972 = vadd.xlane.f32.xlu0 %v971_v40  ;;  %v807_v39 = vpop.xlane.xlu1 %806 }
 0x2d8   :  { %969 = vadd.xlane.f32.xlu0 %v968_v9  ;;  %v810_v44 = vpop.xlane.xlu1 %809 }
 0x2dc   :  { %978 = vadd.xlane.f32.xlu0 %v977_v53  ;;  %v813_v57 = vpop.xlane.xlu1 %812 }
 0x2e0   :  { %975 = vadd.xlane.f32.xlu0 %v974_v18 }
 0x2e4   :  { %984 = vadd.xlane.f32.xlu0 %v983_v31 }
 0x2e8   :  { %981 = vadd.xlane.f32.xlu0 %v980_v34 }
 0x33c   :  { %v943_v51 = vpop.xlane.xlu1 %942 }
 0x33d   :  { %v940_v26 = vpop.xlane.xlu0 %939  ;;  %v987_v43 = vsel %vm789_vm2, %v720_v27, %v943_v51 }
 0x33e   :  { %v986_v42 = vsel %vm789_vm2, %v1675_v16, %v940_v26  ;;  %v1004_v41 = vsel %vm1002_vm3, %v987_v43, %v795_v36 }
 0x33f   :  { %v1003_v52 = vsel %vm1002_vm3, %v986_v42, %v792_v46  ;;  %v1021_v16 = vsel %vm1019_vm4, %v1004_v41, 0.0 }
 0x340   :  { %v1020_v23 = vsel %vm1019_vm4, %v1003_v52, 0.0  ;;  %v816_v6 = vpop.xlane.xlu1 %815 }
 0x341   :  { %v949_v10 = vpop.xlane.xlu0 %948  ;;  %1036 = vxpose.xlu0.b32.start [1/16] (narrow) %v1020_v23, 8 }
 0x342   :  { %v989_v47 = vsel %vm789_vm2, %v722_v60, %v949_v10 }
 0x343   :  { %v1006_v22 = vsel %vm1002_vm3, %v989_v47, %v801_v38 }
 0x344   :  { %v1023_v40 = vsel %vm1019_vm4, %v1006_v22, 0.0  ;;  %v819_v4 = vpop.xlane.xlu1 %818 }
 0x345   :  { %v946_v63 = vpop.xlane.xlu0 %945  ;;  %1037 = vxpose.xlu0.b32.cont [2/16] (narrow) %v1021_v16, 8 }
 0x346   :  { %v988_v25 = vsel %vm789_vm2, %v721_v49, %v946_v63 }
 0x347   :  { %v1005_v24 = vsel %vm1002_vm3, %v988_v25, %v798_v37 }
 0x348   :  { %v1022_v5 = vsel %vm1019_vm4, %v1005_v24, 0.0  ;;  %v822_v18 = vpop.xlane.xlu1 %821 }
 0x349   :  { %v955_v30 = vpop.xlane.xlu0 %954  ;;  %1038 = vxpose.xlu0.b32.cont [3/16] (narrow) %v1022_v5, 8 }
 0x34a   :  { %v991_v3 = vsel %vm789_vm2, %v1720_v58, %v955_v30 }
 0x34b   :  { %v1008_v12 = vsel %vm1002_vm3, %v991_v3, %v807_v39 }
 0x34c   :  { %v1025_v55 = vsel %vm1019_vm4, %v1008_v12, 0.0 }
 0x34d   :  { %v952_v61 = vpop.xlane.xlu0 %951  ;;  %1039 = vxpose.xlu0.b32.cont [4/16] (narrow) %v1023_v40, 8 }
 0x34e   :  { %v990_v9 = vsel %vm789_vm2, %v723_v35, %v952_v61 }
 0x34f   :  { %v1007_v32 = vsel %vm1002_vm3, %v990_v9, %v804_v28 }
 0x350   :  { %v1024_v2 = vsel %vm1019_vm4, %v1007_v32, 0.0 }
 0x351   :  { %v961_v11 = vpop.xlane.xlu0 %960  ;;  %1040 = vxpose.xlu0.b32.cont [5/16] (narrow) %v1024_v2, 8 }
 0x352   :  { %v993_v14 = vsel %vm789_vm2, %v1740_v19, %v961_v11 }
 0x353   :  { %v1010_v21 = vsel %vm1002_vm3, %v993_v14, %v813_v57 }
 0x354   :  { %v1027_v31 = vsel %vm1019_vm4, %v1010_v21, 0.0 }
 0x355   :  { %v958_v53 = vpop.xlane.xlu0 %957  ;;  %1041 = vxpose.xlu0.b32.cont [6/16] (narrow) %v1025_v55, 8 }
 0x356   :  { %v992_v58 = vsel %vm789_vm2, %v1746_v33, %v958_v53  ;;  %v825_v33 = vpop.xlane.xlu1 %824 }
 0x357   :  { %v1009_v15 = vsel %vm1002_vm3, %v992_v58, %v810_v44 }
 0x358   :  { %v1026_v17 = vsel %vm1019_vm4, %v1009_v15, 0.0 }
 0x359   :  { %v967_v7 = vpop.xlane.xlu0 %966  ;;  %1042 = vxpose.xlu0.b32.cont [7/16] (narrow) %v1026_v17, 8 }
 0x35a   :  { %v995_v34 = vsel %vm789_vm2, %v1759_v48, %v967_v7  ;;  %v828_v44 = vpop.xlane.xlu1 %827 }
 0x35b   :  { %v1012_v38 = vsel %vm1002_vm3, %v995_v34, %v819_v4 }
 0x35c   :  { %v1029_v39 = vsel %vm1019_vm4, %v1012_v38, 0.0 }
 0x35d   :  { %v964_v20 = vpop.xlane.xlu0 %963  ;;  %1043 = vxpose.xlu0.b32.cont [8/16] (narrow) %v1027_v31, 8 }
 0x35e   :  { %v994_v19 = vsel %vm789_vm2, %v1766_v59, %v964_v20  ;;  %v831_v26 = vpop.xlane.xlu1 %830 }
 0x35f   :  { %v1011_v36 = vsel %vm1002_vm3, %v994_v19, %v816_v6 }
 0x360   :  { %v1028_v37 = vsel %vm1019_vm4, %v1011_v36, 0.0 }
 0x361   :  { %v973_v28 = vpop.xlane.xlu0 %972  ;;  %1044 = vxpose.xlu0.b32.cont [9/16] (narrow) %v1028_v37, 8 }
 0x362   :  { %v997_v48 = vsel %vm789_vm2, %v1786_v8, %v973_v28  ;;  %v834_v54 = vpop.xlane.xlu1 %833 }
 0x363   :  { %v1014_v27 = vsel %vm1002_vm3, %v997_v48, %v825_v33 }
 0x364   :  { %v1031_v43 = vsel %vm1019_vm4, %v1014_v27, 0.0 }
 0x365   :  { %v970_v57 = vpop.xlane.xlu0 %969  ;;  %1045 = vxpose.xlu0.b32.cont [10/16] (narrow) %v1029_v39, 8 }
 0x366   :  { %v996_v59 = vsel %vm789_vm2, %v1791_v13, %v970_v57 }
 0x367   :  { %v1013_v46 = vsel %vm1002_vm3, %v996_v59, %v822_v18 }
 0x368   :  { %v1030_v50 = vsel %vm1019_vm4, %v1013_v46, 0.0 }
 0x369   :  { %v979_v51 = vpop.xlane.xlu0 %978  ;;  %1046 = vxpose.xlu0.b32.cont [11/16] (narrow) %v1030_v50, 8 }
 0x36a   :  { %v999_v52 = vsel %vm789_vm2, %v1810_v45, %v979_v51  ;;  %v837_v45 = vpop.xlane.xlu1 %836 }
 0x36b   :  { %v1016_v23 = vsel %vm1002_vm3, %v999_v52, %v831_v26 }
 0x36c   :  { %v1033_v41 = vsel %vm1019_vm4, %v1016_v23, 0.0 }
 0x36d   :  { %v976_v42 = vpop.xlane.xlu0 %975  ;;  %1047 = vxpose.xlu0.b32.cont [12/16] (narrow) %v1031_v43, 8 }
 0x36e   :  { %v998_v8 = vsel %vm789_vm2, %v1814_v1, %v976_v42 }
 0x36f   :  { %v1015_v13 = vsel %vm1002_vm3, %v998_v8, %v828_v44 }
 0x370   :  { %v1032_v56 = vsel %vm1019_vm4, %v1015_v13, 0.0 }
 0x371   :  { %v985_v10 = vpop.xlane.xlu0 %984  ;;  %1048 = vxpose.xlu0.b32.cont [13/16] (narrow) %v1032_v56, 8 }
 0x372   :  { %v1001_v49 = vsel %vm789_vm2, %v1826_v62, %v985_v10 }
 0x373   :  { %v1018_v47 = vsel %vm1002_vm3, %v1001_v49, %v837_v45 }
 0x374   :  { %v1035_v25 = vsel %vm1019_vm4, %v1018_v47, 0.0 }
 0x375   :  { %v982_v60 = vpop.xlane.xlu0 %981  ;;  %1049 = vxpose.xlu0.b32.cont [14/16] (narrow) %v1033_v41, 8 }
 0x376   :  { %v1000_v1 = vsel %vm789_vm2, %v1830_v29, %v982_v60 }
 0x377   :  { %v1017_v16 = vsel %vm1002_vm3, %v1000_v1, %v834_v54 }
 0x378   :  { %v1034_v63 = vsel %vm1019_vm4, %v1017_v16, 0.0 }
 0x379   :  { %1050 = vxpose.xlu0.b32.cont [15/16] (narrow) %v1034_v63, 8 }
 0x37d   :  { %1051 = vxpose.xlu0.b32.end [16/16] (narrow) %v1035_v25, 8 }
 0x3c1   :  { %v1052_v24 = vpop.trf.xlu0 }
 0x3c2   :  { %1068 = vst [vmem:[%s1959_s7] sm:$0xff] %v1052_v24 }

</bundles_post_ra>
